<compile_context>
chip_gen: v6e
topology: v6e:2x2x1
jax: 0.10.0
libtpu: 0.0.40
codegen_flags: <defaults>
</compile_context>

<pallas_src>
import jax
import jax.numpy as jnp
from jax.experimental import pallas as pl
from jax.experimental.pallas import tpu as pltpu


# ---------------------------------------------------------------------------
# Hardware heuristics
# ---------------------------------------------------------------------------

def _device_kind():
    try:
        return jax.devices()[0].device_kind.lower()
    except Exception:
        return ""


def _num_tensorcores_per_chip():
    """2 TensorCores share the 'parallel' grid axis on v7x and megacore
    (v4/v5p); v2/v3/v5e/v6e expose a single core per device."""
    kind = _device_kind()
    if "v7" in kind or "v4" in kind or "v5p" in kind:
        return 2
    return 1


def _vmem_capacity_bytes():
    """Physical VMEM per core; 128 MiB on v5e/v6e, 64 MiB on v7x."""
    try:
        cap = int(pltpu.get_tpu_info().vmem_capacity_bytes)
        if cap > 0:
            return cap
    except Exception:
        pass
    kind = _device_kind()
    if "v7" in kind:
        return 64 * 1024 * 1024
    if kind:
        return 128 * 1024 * 1024
    return 64 * 1024 * 1024          # unknown: stay conservative


def _single_buffered_spec(block_shape, index_map):
    """Single-buffered BlockSpec for grid-invariant operands.  Falls back to
    the default (double-buffered) spec if this JAX build lacks pl.Buffered."""
    if hasattr(pl, "Buffered"):
        try:
            return pl.BlockSpec(block_shape, index_map,
                                pipeline_mode=pl.Buffered(1))
        except TypeError:
            pass
    return pl.BlockSpec(block_shape, index_map)


def _choose_batch_tile(n, max_tile, prefer_even_grid=False):
    """Largest batch tile dividing n (preferring sublane-aligned multiples of
    8).  On 2-TensorCore chips also prefer an even grid length so both cores
    get equal work, but never drop below 128 rows for that."""
    max_tile = max(1, min(max_tile, n))
    cands = [t for t in range(max_tile, 0, -1) if n % t == 0]
    aligned = [t for t in cands if t % 8 == 0]
    pool = aligned if aligned else [n]     # full extent is always a legal block
    if prefer_even_grid:
        even = [t for t in pool if (n // t) % 2 == 0 and t >= 128]
        if even:
            return even[0]
    return pool[0]


def _choose_col_tile(h, max_tile=512):
    """Largest lane-aligned (multiple-of-128) column tile dividing h, used when
    streaming (H, TN) weight slabs; falls back to the full extent."""
    if h <= max_tile:
        return h
    for tn in range(max_tile - max_tile % 128, 127, -128):
        if h % tn == 0:
            return tn
    return h


# ---------------------------------------------------------------------------
# Kernels
# ---------------------------------------------------------------------------

def _fused_block_kernel(x_ref, w1_ref, w2_ref, shift_ref, o_ref):
    """relu(bn1(fc1(x))) -> relu(bn2(fc2(.))) -> + x on one (TB, H) row tile.

    Bias and eval-mode BatchNorm are pre-folded into the (bf16) weights and a
    per-feature shift, so the hot path is dot -> +shift -> relu (x2) -> +x.
    Both dots accumulate in f32 on the MXU; elementwise math stays f32.
    """
    w_dtype = w1_ref.dtype
    shifts = shift_ref[...]                                        # (2, H) f32

    y = jnp.dot(x_ref[...].astype(w_dtype), w1_ref[...],
                preferred_element_type=jnp.float32)                # (TB, H)
    y = jnp.maximum(y + shifts[0:1, :], 0.0)

    y = jnp.dot(y.astype(w_dtype), w2_ref[...],
                preferred_element_type=jnp.float32)
    y = jnp.maximum(y + shifts[1:2, :], 0.0)

    # Residual: re-read x from its VMEM input buffer rather than keeping it
    # live in vregs across both matmuls.
    o_ref[...] = (x_ref[...].astype(jnp.float32) + y).astype(o_ref.dtype)


def _stage_kernel(x_ref, w_ref, shift_ref, o_ref):
    """One (TB, TN) column tile of relu(x @ W + shift) (streamed-weight path)."""
    y = jnp.dot(x_ref[...].astype(w_ref.dtype), w_ref[...],
                preferred_element_type=jnp.float32)
    o_ref[...] = jnp.maximum(y + shift_ref[...], 0.0).astype(o_ref.dtype)


def _stage_residual_kernel(x_ref, w_ref, shift_ref, res_ref, o_ref):
    """One (TB, TN) column tile of res + relu(x @ W + shift)."""
    y = jnp.dot(x_ref[...].astype(w_ref.dtype), w_ref[...],
                preferred_element_type=jnp.float32)
    y = jnp.maximum(y + shift_ref[...], 0.0)
    o_ref[...] = (res_ref[...].astype(jnp.float32) + y).astype(o_ref.dtype)


# ---------------------------------------------------------------------------
# pallas_call wrappers
# ---------------------------------------------------------------------------

def _fused_call(x, w1f, w2f, shifts, *, tb, out_dtype, vmem_limit, single_buffer):
    N, H = x.shape
    row_spec = pl.BlockSpec((tb, H), lambda i: (i, 0))
    if single_buffer:
        w_spec = _single_buffered_spec((H, H), lambda i: (0, 0))
        s_spec = _single_buffered_spec((2, H), lambda i: (0, 0))
    else:
        w_spec = pl.BlockSpec((H, H), lambda i: (0, 0))
        s_spec = pl.BlockSpec((2, H), lambda i: (0, 0))

    return pl.pallas_call(
        _fused_block_kernel,
        out_shape=jax.ShapeDtypeStruct((N, H), out_dtype),
        grid_spec=pltpu.PrefetchScalarGridSpec(
            num_scalar_prefetch=0,
            grid=(N // tb,),
            in_specs=[row_spec,      # x
                      w_spec,        # folded w1 (bf16)
                      w_spec,        # folded w2 (bf16)
                      s_spec],       # packed shifts (2, H)
            out_specs=pl.BlockSpec((tb, H), lambda i: (i, 0)),
        ),
        compiler_params=pltpu.CompilerParams(
            dimension_semantics=("parallel",),
            vmem_limit_bytes=vmem_limit),
    )(x, w1f, w2f, shifts)


def _streamed_stage_call(x, w, shift, residual, *, tb, tn, out_dtype, vmem_limit):
    N, H = x.shape
    Ho = w.shape[1]
    grid = (N // tb, Ho // tn)

    x_spec = pl.BlockSpec((tb, H), lambda i, j: (i, 0))
    w_spec = pl.BlockSpec((H, tn), lambda i, j: (0, j))
    s_spec = pl.BlockSpec((1, tn), lambda i, j: (0, j))
    o_spec = pl.BlockSpec((tb, tn), lambda i, j: (i, j))
    shift2d = shift.reshape(1, Ho).astype(jnp.float32)

    if residual is None:
        kernel = _stage_kernel
        in_specs = [x_spec, w_spec, s_spec]
        args = (x, w, shift2d)
    else:
        kernel = _stage_residual_kernel
        in_specs = [x_spec, w_spec, s_spec,
                    pl.BlockSpec((tb, tn), lambda i, j: (i, j))]
        args = (x, w, shift2d, residual)

    return pl.pallas_call(
        kernel,
        out_shape=jax.ShapeDtypeStruct((N, Ho), out_dtype),
        grid_spec=pltpu.PrefetchScalarGridSpec(
            num_scalar_prefetch=0,
            grid=grid,
            in_specs=in_specs,
            out_specs=o_spec,
        ),
        compiler_params=pltpu.CompilerParams(
            dimension_semantics=("parallel", "parallel"),
            vmem_limit_bytes=vmem_limit),
    )(*args)


# ---------------------------------------------------------------------------
# Public entry point
# ---------------------------------------------------------------------------

def linear_block(x, params, *, weight_dtype=jnp.bfloat16, max_batch_tile=1024,
                 max_col_tile=512, out_dtype=None, force_streaming=False):
    """Forward pass of the PyTorch `Linear` residual block (eval path):
        y = relu(bn1(fc1(x))); y = relu(bn2(fc2(y))); return x + y

    x: (N, H) activations.  params: dict from init_params (W stored as
    (in_features, out_features) so the kernels compute x @ W).

    out_dtype (optional, e.g. jnp.bfloat16): emit the output in a narrower
    dtype to halve writeback traffic in the HBM-bound regime (changes the
    interface numerics, so it is off by default).
    """
    N, H = x.shape
    out_dtype = jnp.dtype(x.dtype) if out_dtype is None else jnp.dtype(out_dtype)
    eps = 1e-5

    # --- host-side constant folding: bias + eval-mode BN baked into W / shift
    def fold(w, b, gamma, beta, rmean, rvar):
        scale = gamma / jnp.sqrt(rvar + eps)                        # (H,)
        w_f = (w * scale[None, :]).astype(weight_dtype)             # (H, H)
        shift = ((b - rmean) * scale + beta).astype(jnp.float32)    # (H,)
        return w_f, shift

    w1f, sh1 = fold(params["w1"], params["b1"], params["bn1_gamma"],
                    params["bn1_beta"], params["bn1_mean"], params["bn1_var"])
    w2f, sh2 = fold(params["w2"], params["b2"], params["bn2_gamma"],
                    params["bn2_beta"], params["bn2_mean"], params["bn2_var"])

    w_item = jnp.dtype(weight_dtype).itemsize
    x_item = jnp.dtype(x.dtype).itemsize
    o_item = out_dtype.itemsize
    prefer_even = _num_tensorcores_per_chip() >= 2
    cap = int(0.85 * _vmem_capacity_bytes())   # headroom for Mosaic scratch
    floor = 32 * 1024 * 1024                   # never request below the default

    # ------------------------------------------------------------------ fused
    # Fully-resident path: both (H, H) weights live in VMEM (single-buffered),
    # the grid tiles only the batch ("parallel" -> sharded across TCs on v7x).
    tb = _choose_batch_tile(N, max_batch_tile, prefer_even)

    def fused_bytes(tile, w_bufs):
        return (w_bufs * 2 * H * H * w_item          # W1 + W2
                + w_bufs * 2 * H * 4                 # packed shifts
                + 2 * tile * H * (x_item + o_item))  # double-buffered x / out

    while fused_bytes(tb, 1) > cap and tb % 16 == 0 and tb > 128:
        tb //= 2

    if (not force_streaming) and fused_bytes(tb, 1) <= cap:
        shifts = jnp.stack([sh1, sh2], axis=0)                      # (2, H)
        # Limit sized for the double-buffered fallback too, clamped to cap.
        vmem_limit = int(min(cap, max(floor, 1.2 * fused_bytes(tb, 2))))
        try:
            return _fused_call(x, w1f, w2f, shifts, tb=tb, out_dtype=out_dtype,
                               vmem_limit=vmem_limit, single_buffer=True)
        except Exception:
            # pl.Buffered(1) rejected on this build: retry with the default
            # double-buffered constant operands (same math, 2x weight VMEM).
            return _fused_call(x, w1f, w2f, shifts, tb=tb, out_dtype=out_dtype,
                               vmem_limit=vmem_limit, single_buffer=False)

    # --------------------------------------------------------------- streamed
    # Large-H path (resident weights exceed VMEM -- v7x's 64 MiB first): run
    # the block as two column-tiled passes so each grid step only holds an
    # (H, TN) weight slab; the f32 intermediate makes one HBM round trip.
    tn = _choose_col_tile(H, max_col_tile)
    tb = _choose_batch_tile(N, min(max_batch_tile, 512), prefer_even)

    def streamed_bytes(tile):
        return (2 * tile * H * 4                        # x / y1 row tile (f32)
                + 2 * H * tn * w_item                   # weight column tiles
                + 2 * tile * tn * (4 + max(4, o_item))  # out + residual tiles
                + 2 * 2 * tn * 4)                       # shift tiles

    while streamed_bytes(tb) > cap and tb % 16 == 0 and tb > 128:
        tb //= 2
    vmem_limit = int(min(cap, max(floor, 1.25 * streamed_bytes(tb))))

    y1 = _streamed_stage_call(x, w1f, sh1, None, tb=tb, tn=tn,
                              out_dtype=jnp.float32, vmem_limit=vmem_limit)
    return _streamed_stage_call(y1, w2f, sh2, x, tb=tb, tn=tn,
                                out_dtype=out_dtype, vmem_limit=vmem_limit)


# ---------------------------------------------------------------------------
# Parameters / reference
# ---------------------------------------------------------------------------

def init_params(key, n_hidden):
    """Deterministic synthetic parameters matching nn.Linear / nn.BatchNorm1d."""
    ks = jax.random.split(key, 12)
    bound = 1.0 / jnp.sqrt(n_hidden)
    u = lambda k, shape: jax.random.uniform(k, shape, jnp.float32, -bound, bound)
    return {
        "w1": u(ks[0], (n_hidden, n_hidden)),
        "b1": u(ks[1], (n_hidden,)),
        "w2": u(ks[2], (n_hidden, n_hidden)),
        "b2": u(ks[3], (n_hidden,)),
        "bn1_gamma": 1.0 + 0.1 * jax.random.normal(ks[4], (n_hidden,)),
        "bn1_beta":  0.1 * jax.random.normal(ks[5], (n_hidden,)),
        "bn1_mean":  0.05 * jax.random.normal(ks[6], (n_hidden,)),
        "bn1_var":   jnp.abs(1.0 + 0.1 * jax.random.normal(ks[7], (n_hidden,))),
        "bn2_gamma": 1.0 + 0.1 * jax.random.normal(ks[8], (n_hidden,)),
        "bn2_beta":  0.1 * jax.random.normal(ks[9], (n_hidden,)),
        "bn2_mean":  0.05 * jax.random.normal(ks[10], (n_hidden,)),
        "bn2_var":   jnp.abs(1.0 + 0.1 * jax.random.normal(ks[11], (n_hidden,))),
    }


def _reference(x, params):
    """Pure-JAX f32 reference of the same forward pass (eval-mode BN)."""
    eps = 1e-5
    y = x @ params["w1"] + params["b1"]
    y = (y - params["bn1_mean"]) / jnp.sqrt(params["bn1_var"] + eps)
    y = y * params["bn1_gamma"] + params["bn1_beta"]
    y = jnp.maximum(y, 0.0)
    y = y @ params["w2"] + params["b2"]
    y = (y - params["bn2_mean"]) / jnp.sqrt(params["bn2_var"] + eps)
    y = y * params["bn2_gamma"] + params["bn2_beta"]
    y = jnp.maximum(y, 0.0)
    return x + y


if __name__ == "__main__":
    # TODO(synk): training-mode BatchNorm (batch statistics) and Dropout
    # (is_train_good=True path) are not implemented; eval-mode semantics only.
    key = jax.random.PRNGKey(0)
    k1, k2, k3, k4 = jax.random.split(key, 4)

    # --- main test: fused fully-resident kernel ---------------------------
    n_hidden, batch = 128, 16
    x = jax.random.normal(k1, (batch, n_hidden), jnp.float32)
    params = init_params(k2, n_hidden)

    out = jax.block_until_ready(linear_block(x, params))
    ref = _reference(x, params)
    assert out.shape == (batch, n_hidden)
    # bf16 weights/intermediates: error grows mildly (~sqrt(H)) with fan-in.
    tol = 3e-2 * max(1.0, (n_hidden / 128.0) ** 0.5)
    assert jnp.allclose(out, ref, atol=tol, rtol=tol), "fused path mismatch"

    # --- also exercise the large-H streamed (column-tiled) fallback -------
    n_hidden2, batch2 = 256, 32
    x2 = jax.random.normal(k3, (batch2, n_hidden2), jnp.float32)
    params2 = init_params(k4, n_hidden2)
    out2 = jax.block_until_ready(
        linear_block(x2, params2, force_streaming=True, max_col_tile=128))
    ref2 = _reference(x2, params2)
    assert out2.shape == (batch2, n_hidden2)
    tol2 = 3e-2 * max(1.0, (n_hidden2 / 128.0) ** 0.5)
    assert jnp.allclose(out2, ref2, atol=tol2, rtol=tol2), "streamed path mismatch"

    print("KERNEL_OK")
</pallas_src>

<mosaic_0001>
module attributes {stable_mosaic.version = 11 : i64} {
  func.func @_fused_block_kernel(%arg0: i32, %arg1: memref<16x128xf32, #tpu.memory_space<vmem>>, %arg2: memref<128x128xbf16, #tpu.memory_space<vmem>>, %arg3: memref<128x128xbf16, #tpu.memory_space<vmem>>, %arg4: memref<2x128xf32, #tpu.memory_space<vmem>>, %arg5: memref<16x128xf32, #tpu.memory_space<vmem>>) attributes {dimension_semantics = [#tpu.dimension_semantics<parallel>], iteration_bounds = array<i64: 1>, scalar_prefetch = 0 : i64, scratch_operands = 0 : i64, tpu.core_type = #tpu.core_type<tc>, window_params = [{transform_indices = @transform_0, window_bounds = array<i64: 16, 128>}, {pipeline_mode = #tpu.pipeline_mode<synchronous>, transform_indices = @transform_1, window_bounds = array<i64: 128, 128>}, {pipeline_mode = #tpu.pipeline_mode<synchronous>, transform_indices = @transform_2, window_bounds = array<i64: 128, 128>}, {pipeline_mode = #tpu.pipeline_mode<synchronous>, transform_indices = @transform_3, window_bounds = array<i64: 2, 128>}, {transform_indices = @transform_4, window_bounds = array<i64: 16, 128>}]} {
    %c0 = arith.constant 0 : index
    %c0_0 = arith.constant 0 : index
    %0 = vector.load %arg4[%c0, %c0_0] : memref<2x128xf32, #tpu.memory_space<vmem>>, vector<2x128xf32>
    %c0_1 = arith.constant 0 : index
    %c0_2 = arith.constant 0 : index
    %1 = vector.load %arg1[%c0_1, %c0_2] : memref<16x128xf32, #tpu.memory_space<vmem>>, vector<16x128xf32>
    %2 = arith.truncf %1 : vector<16x128xf32> to vector<16x128xbf16>
    %c0_3 = arith.constant 0 : index
    %c0_4 = arith.constant 0 : index
    %3 = vector.load %arg2[%c0_3, %c0_4] : memref<128x128xbf16, #tpu.memory_space<vmem>>, vector<128x128xbf16>
    %cst = arith.constant dense<0.000000e+00> : vector<16x128xf32>
    %4 = tpu.matmul %2, %3, %cst {dimension_numbers = #tpu.dot_dimension_numbers<[1], [0], [0], [1], [0, 0, 1, 1], [], []>} : vector<16x128xbf16>, vector<128x128xbf16>, vector<16x128xf32> -> vector<16x128xf32>
    %5 = vector.extract_strided_slice %0 {offsets = [0, 0], sizes = [1, 128], strides = [1, 1]} : vector<2x128xf32> to vector<1x128xf32>
    %6 = vector.broadcast %5 : vector<1x128xf32> to vector<16x128xf32>
    %7 = arith.addf %4, %6 : vector<16x128xf32>
    %cst_5 = arith.constant 0.000000e+00 : f32
    %8 = vector.broadcast %cst_5 : f32 to vector<16x128xf32>
    %9 = arith.maximumf %7, %8 : vector<16x128xf32>
    %10 = arith.truncf %9 : vector<16x128xf32> to vector<16x128xbf16>
    %c0_6 = arith.constant 0 : index
    %c0_7 = arith.constant 0 : index
    %11 = vector.load %arg3[%c0_6, %c0_7] : memref<128x128xbf16, #tpu.memory_space<vmem>>, vector<128x128xbf16>
    %cst_8 = arith.constant dense<0.000000e+00> : vector<16x128xf32>
    %12 = tpu.matmul %10, %11, %cst_8 {dimension_numbers = #tpu.dot_dimension_numbers<[1], [0], [0], [1], [0, 0, 1, 1], [], []>} : vector<16x128xbf16>, vector<128x128xbf16>, vector<16x128xf32> -> vector<16x128xf32>
    %13 = vector.extract_strided_slice %0 {offsets = [1, 0], sizes = [1, 128], strides = [1, 1]} : vector<2x128xf32> to vector<1x128xf32>
    %14 = vector.broadcast %13 : vector<1x128xf32> to vector<16x128xf32>
    %15 = arith.addf %12, %14 : vector<16x128xf32>
    %cst_9 = arith.constant 0.000000e+00 : f32
    %16 = vector.broadcast %cst_9 : f32 to vector<16x128xf32>
    %17 = arith.maximumf %15, %16 : vector<16x128xf32>
    %c0_10 = arith.constant 0 : index
    %c0_11 = arith.constant 0 : index
    %18 = vector.load %arg1[%c0_10, %c0_11] : memref<16x128xf32, #tpu.memory_space<vmem>>, vector<16x128xf32>
    %19 = arith.addf %18, %17 : vector<16x128xf32>
    %c0_12 = arith.constant 0 : index
    %c0_13 = arith.constant 0 : index
    %20 = vector.load %arg5[%c0_12, %c0_13] : memref<16x128xf32, #tpu.memory_space<vmem>>, vector<16x128xf32>
    tpu.vector_store %arg5[%c0_12, %c0_13], %19 {strides = array<i32>} : memref<16x128xf32, #tpu.memory_space<vmem>>, vector<16x128xf32>,
    return
  }
  func.func @transform_0(%arg0: i32) -> (i32, i32) {
    %c0_i32 = arith.constant 0 : i32
    %c0_i32_0 = arith.constant 0 : i32
    return %arg0, %c0_i32 : i32, i32
  }
  func.func @transform_1(%arg0: i32) -> (i32, i32) {
    %c0_i32 = arith.constant 0 : i32
    %c0_i32_0 = arith.constant 0 : i32
    %c0_i32_1 = arith.constant 0 : i32
    return %c0_i32, %c0_i32_0 : i32, i32
  }
  func.func @transform_2(%arg0: i32) -> (i32, i32) {
    %c0_i32 = arith.constant 0 : i32
    %c0_i32_0 = arith.constant 0 : i32
    %c0_i32_1 = arith.constant 0 : i32
    return %c0_i32, %c0_i32_0 : i32, i32
  }
  func.func @transform_3(%arg0: i32) -> (i32, i32) {
    %c0_i32 = arith.constant 0 : i32
    %c0_i32_0 = arith.constant 0 : i32
    %c0_i32_1 = arith.constant 0 : i32
    return %c0_i32, %c0_i32_0 : i32, i32
  }
  func.func @transform_4(%arg0: i32) -> (i32, i32) {
    %c0_i32 = arith.constant 0 : i32
    %c0_i32_0 = arith.constant 0 : i32
    return %arg0, %c0_i32 : i32, i32
  }
}

module attributes {stable_mosaic.version = 11 : i64} {
  func.func @_fused_block_kernel(%arg0: i32, %arg1: memref<16x128xf32, #tpu.memory_space<vmem>>, %arg2: memref<128x128xbf16, #tpu.memory_space<vmem>>, %arg3: memref<128x128xbf16, #tpu.memory_space<vmem>>, %arg4: memref<2x128xf32, #tpu.memory_space<vmem>>, %arg5: memref<16x128xf32, #tpu.memory_space<vmem>>) attributes {dimension_semantics = [#tpu.dimension_semantics<parallel>], iteration_bounds = array<i64: 1>, scalar_prefetch = 0 : i64, scratch_operands = 0 : i64, tpu.core_type = #tpu.core_type<tc>, window_params = [{transform_indices = @transform_0, window_bounds = array<i64: 16, 128>}, {pipeline_mode = #tpu.pipeline_mode<synchronous>, transform_indices = @transform_1, window_bounds = array<i64: 128, 128>}, {pipeline_mode = #tpu.pipeline_mode<synchronous>, transform_indices = @transform_2, window_bounds = array<i64: 128, 128>}, {pipeline_mode = #tpu.pipeline_mode<synchronous>, transform_indices = @transform_3, window_bounds = array<i64: 2, 128>}, {transform_indices = @transform_4, window_bounds = array<i64: 16, 128>}]} {
    %c0 = arith.constant 0 : index
    %c0_0 = arith.constant 0 : index
    %0 = vector.load %arg4[%c0, %c0_0] : memref<2x128xf32, #tpu.memory_space<vmem>>, vector<2x128xf32>
    %c0_1 = arith.constant 0 : index
    %c0_2 = arith.constant 0 : index
    %1 = vector.load %arg1[%c0_1, %c0_2] : memref<16x128xf32, #tpu.memory_space<vmem>>, vector<16x128xf32>
    %2 = arith.truncf %1 : vector<16x128xf32> to vector<16x128xbf16>
    %c0_3 = arith.constant 0 : index
    %c0_4 = arith.constant 0 : index
    %3 = vector.load %arg2[%c0_3, %c0_4] : memref<128x128xbf16, #tpu.memory_space<vmem>>, vector<128x128xbf16>
    %cst = arith.constant dense<0.000000e+00> : vector<16x128xf32>
    %4 = tpu.matmul %2, %3, %cst {dimension_numbers = #tpu.dot_dimension_numbers<[1], [0], [0], [1], [0, 0, 1, 1], [], []>} : vector<16x128xbf16>, vector<128x128xbf16>, vector<16x128xf32> -> vector<16x128xf32>
    %5 = vector.extract_strided_slice %0 {offsets = [0, 0], sizes = [1, 128], strides = [1, 1]} : vector<2x128xf32> to vector<1x128xf32>
    %6 = vector.broadcast %5 : vector<1x128xf32> to vector<16x128xf32>
    %7 = arith.addf %4, %6 : vector<16x128xf32>
    %cst_5 = arith.constant 0.000000e+00 : f32
    %8 = vector.broadcast %cst_5 : f32 to vector<16x128xf32>
    %9 = arith.maximumf %7, %8 : vector<16x128xf32>
    %10 = arith.truncf %9 : vector<16x128xf32> to vector<16x128xbf16>
    %c0_6 = arith.constant 0 : index
    %c0_7 = arith.constant 0 : index
    %11 = vector.load %arg3[%c0_6, %c0_7] : memref<128x128xbf16, #tpu.memory_space<vmem>>, vector<128x128xbf16>
    %cst_8 = arith.constant dense<0.000000e+00> : vector<16x128xf32>
    %12 = tpu.matmul %10, %11, %cst_8 {dimension_numbers = #tpu.dot_dimension_numbers<[1], [0], [0], [1], [0, 0, 1, 1], [], []>} : vector<16x128xbf16>, vector<128x128xbf16>, vector<16x128xf32> -> vector<16x128xf32>
    %13 = vector.extract_strided_slice %0 {offsets = [1, 0], sizes = [1, 128], strides = [1, 1]} : vector<2x128xf32> to vector<1x128xf32>
    %14 = vector.broadcast %13 : vector<1x128xf32> to vector<16x128xf32>
    %15 = arith.addf %12, %14 : vector<16x128xf32>
    %cst_9 = arith.constant 0.000000e+00 : f32
    %16 = vector.broadcast %cst_9 : f32 to vector<16x128xf32>
    %17 = arith.maximumf %15, %16 : vector<16x128xf32>
    %c0_10 = arith.constant 0 : index
    %c0_11 = arith.constant 0 : index
    %18 = vector.load %arg1[%c0_10, %c0_11] : memref<16x128xf32, #tpu.memory_space<vmem>>, vector<16x128xf32>
    %19 = arith.addf %18, %17 : vector<16x128xf32>
    %c0_12 = arith.constant 0 : index
    %c0_13 = arith.constant 0 : index
    %20 = vector.load %arg5[%c0_12, %c0_13] : memref<16x128xf32, #tpu.memory_space<vmem>>, vector<16x128xf32>
    tpu.vector_store %arg5[%c0_12, %c0_13], %19 {strides = array<i32>} : memref<16x128xf32, #tpu.memory_space<vmem>>, vector<16x128xf32>,
    return
  }
  func.func @transform_0(%arg0: i32) -> (i32, i32) {
    %c0_i32 = arith.constant 0 : i32
    %c0_i32_0 = arith.constant 0 : i32
    return %arg0, %c0_i32 : i32, i32
  }
  func.func @transform_1(%arg0: i32) -> (i32, i32) {
    %c0_i32 = arith.constant 0 : i32
    %c0_i32_0 = arith.constant 0 : i32
    %c0_i32_1 = arith.constant 0 : i32
    return %c0_i32, %c0_i32_0 : i32, i32
  }
  func.func @transform_2(%arg0: i32) -> (i32, i32) {
    %c0_i32 = arith.constant 0 : i32
    %c0_i32_0 = arith.constant 0 : i32
    %c0_i32_1 = arith.constant 0 : i32
    return %c0_i32, %c0_i32_0 : i32, i32
  }
  func.func @transform_3(%arg0: i32) -> (i32, i32) {
    %c0_i32 = arith.constant 0 : i32
    %c0_i32_0 = arith.constant 0 : i32
    %c0_i32_1 = arith.constant 0 : i32
    return %c0_i32, %c0_i32_0 : i32, i32
  }
  func.func @transform_4(%arg0: i32) -> (i32, i32) {
    %c0_i32 = arith.constant 0 : i32
    %c0_i32_0 = arith.constant 0 : i32
    return %arg0, %c0_i32 : i32, i32
  }
}

</mosaic_0001>

<bundles_post_ra>
// kernel: tpu_custom_call.1
= control target key start
LH: loop header
LB: loop body
LE: loop exit
PB: predicated region body
PF: predicated region fallthrough
CT: control target
= control target key end

     0   :  { %9 = vsyncpa [#allocation3], 0  ;;  %s551_s0 = inlined_call_operand.hbm [shape: f32[16,128], index: 0, kind: input, shape index: {}]   ;;  %s552_s1 = inlined_call_operand.hbm [shape: bf16[128,128], index: 1, kind: input, shape index: {}]   ;;  %s553_s2 = inlined_call_operand.hbm [shape: bf16[128,128], index: 2, kind: input, shape index: {}]   ;;  %s554_s3 = inlined_call_operand.vmem [shape: f32[2,128], index: 3, kind: input, shape index: {}]   ;;  %s555_s4 = inlined_call_operand.hbm [shape: f32[16,128], index: 4, kind: output, shape index: {}]  }
   0x1   :  { %10 = vsyncpa [#allocation6], 0 }
   0x2   :  { %11 = vsyncpa [#allocation4], 0  ;;  %s495_s15 = smov [#allocation5]  }
   0x3   :  { %s29_s16 = sshll.u32 %s495_s15, 4  ;;  %s30_s16 = int_to_ptr.vmem [resolvable:$true] %s29_s16 }
   0x4   :  { %s417_s17 = scalar_lea.vmem %s30_s16, 1024  ;;  %p422_p1 = scmp.lt.s32.totalorder %s30_s16, %s30_s16 }
   0x5   :  { %p418_p0 = scmp.ne.s32.totalorder %s30_s16, %s417_s17  ;;  %p423_p2 = scmp.lt.s32.totalorder %s417_s17, %s417_s17 }
   0x7   :  { %p424_p3 = por %p423_p2, %p422_p1 }
   0x9   :  { %p425_p4 = pnand %p424_p3, %p418_p0 }
   0xb   :  { %428 = shalt.err (!%p425_p4)
}
   0xc   :  { %s496_s18 = smov 64   ;;  %s497_s19 = smov 4  }
   0xd   :  { %35 = dma.hbm_to_vmem [thread:$0]  %s552_s1, 1024, %s30_s16, [#allocation6], %s496_s18, %s496_s18, %s497_s19  }
   0xe   :  { %s498_s22 = smov [#allocation2]  }
   0xf   :  { %s17_s23 = sshll.u32 %s498_s22, 4  ;;  %s18_s23 = int_to_ptr.vmem [resolvable:$true] %s17_s23 }
  0x10   :  { %s437_s24 = scalar_lea.vmem %s18_s23, 256  ;;  %p442_p6 = scmp.lt.s32.totalorder %s18_s23, %s18_s23 }
  0x11   :  { %p438_p5 = scmp.ne.s32.totalorder %s18_s23, %s437_s24  ;;  %p443_p7 = scmp.lt.s32.totalorder %s437_s24, %s437_s24 }
  0x13   :  { %p444_p8 = por %p443_p7, %p442_p6 }
  0x15   :  { %p445_p9 = pnand %p444_p8, %p438_p5 }
  0x17   :  { %448 = shalt.err (!%p445_p9)
}
  0x18   :  { %s499_s25 = smov 128   ;;  %s500_s26 = smov 8  }
  0x19   :  { %23 = dma.hbm_to_vmem [thread:$0]  %s551_s0, 256, %s18_s23, [#allocation3], %s499_s25, %s499_s25, %s500_s26  }
  0x1a   :  { %s501_s1 = smov [#allocation7]  }
  0x1b   :  { %s41_s29 = sshll.u32 %s501_s1, 4  ;;  %s42_s29 = int_to_ptr.vmem [resolvable:$true] %s41_s29 }
  0x1c   :  { %s457_s30 = scalar_lea.vmem %s42_s29, 1024  ;;  %p462_p11 = scmp.lt.s32.totalorder %s42_s29, %s42_s29 }
  0x1d   :  { %p458_p10 = scmp.ne.s32.totalorder %s42_s29, %s457_s30  ;;  %p463_p12 = scmp.lt.s32.totalorder %s457_s30, %s457_s30 }
  0x1f   :  { %p464_p13 = por %p463_p12, %p462_p11 }
  0x21   :  { %p465_p0 = pnand %p464_p13, %p458_p10 }
  0x23   :  { %468 = shalt.err (!%p465_p0)
}
  0x24   :  { %47 = dma.hbm_to_vmem [thread:$0]  %s553_s2, 1024, %s42_s29, [#allocation6], %s496_s18, %s496_s18, %s497_s19  }
  0x25   :  { %489 = dma.done.wait [#allocation3], 256  }
  0x26   :  { %490 = vsyncadd [#allocation3], 4294967040 }
  0x27   :  { %491 = dma.done.wait [#allocation6], 2048  }
  0x28   :  { %492 = vsyncadd [#allocation6], 4294965248  ;;  %v502_v0 = vmov 0.0   ;;  %vm503_vm0 = vmmov 0   ;;  %v393_v1 = vld [vmem:[#allocation5 + $0x38] sm:$0xff]   ;;  %v394_v2 = vld [vmem:[#allocation5 + $0x30] sm:$0xff]   ;;  %v80_v20 = vlaneseq }
  0x29   :  { %343 = vmatprep.subr.bf16.mxu0 %v502_v0  ;;  %359 = vmatprep.mubr.msk.bf16.mxu0 %vm503_vm0, %v502_v0  ;;  %v395_v3 = vld [vmem:[#allocation5 + $0x28] sm:$0xff]   ;;  %v401_v4 = vld [vmem:[#allocation7 + $0x38] sm:$0xff]   ;;  %v396_v5 = vld [vmem:[#allocation5 + $0x20] sm:$0xff]  }
  0x2a   :  { %363 = vmatprep.subr.bf16.mxu1 %v502_v0  ;;  %379 = vmatprep.mubr.msk.bf16.mxu1 %vm503_vm0, %v502_v0  ;;  %v402_v6 = vld [vmem:[#allocation7 + $0x30] sm:$0xff]   ;;  %v397_v7 = vld [vmem:[#allocation5 + $0x18] sm:$0xff]   ;;  %v403_v8 = vld [vmem:[#allocation7 + $0x28] sm:$0xff]   ;;  %v81_v21 = vshrl.u32 %v80_v20, 7 }
  0x2b   :  { %344 = vmatpush3.bf16.msra.mxu0 %v393_v1  ;;  %364 = vmatpush3.bf16.msra.mxu1 %v401_v4  ;;  %v398_v9 = vld [vmem:[#allocation5 + $0x10] sm:$0xff]   ;;  %v404_v10 = vld [vmem:[#allocation7 + $0x20] sm:$0xff]   ;;  %v399_v11 = vld [vmem:[#allocation5 + $0x8] sm:$0xff]  }
  0x2c   :  { %345 = vmatprep.subr.bf16.mxu0 %v502_v0  ;;  %365 = vmatprep.subr.bf16.mxu1 %v502_v0  ;;  %v405_v12 = vld [vmem:[#allocation7 + $0x18] sm:$0xff]   ;;  %v400_v13 = vld [vmem:[#allocation5] sm:$0xff]   ;;  %v61_v14 = vld [vmem:[#allocation2] sm:$0xff]  ;;  %v82_v22 = vsub.s32 0, %v81_v21  ;;  %v194_v34 = vsub.s32 1, %v81_v21 }
  0x2d   :  { %v62_v15 = vld [vmem:[#allocation2 + $0x8] sm:$0xff]  ;;  %v406_v17 = vld [vmem:[#allocation7 + $0x10] sm:$0xff]   ;;  %v407_v18 = vld [vmem:[#allocation7 + $0x8] sm:$0xff]  }
  0x2e   :  { %v63_v16 = vpack.c.bf16 %v62_v15, %v61_v14  ;;  %v408_v19 = vld [vmem:[#allocation7] sm:$0xff]   ;;  %v60_v23 = vld [vmem:[%s554_s3] sm:$0x3]  ;;  %s504_s3 = smov [#allocation8]  }
  0x2f   :  { %346 = vmatpush3.bf16.msra.mxu0 %v394_v2  ;;  %366 = vmatpush3.bf16.msra.mxu1 %v402_v6  ;;  %v83_v24 = vrot.slane %v60_v23, %v82_v22  ;;  %v195_v35 = vrot.slane %v60_v23, %v194_v34  ;;  %s296_s7 = sshll.u32 %s504_s3, 4  ;;  %s297_s7 = int_to_ptr.vmem [resolvable:$true] %s296_s7 }
  0x30   :  { %347 = vmatprep.subr.bf16.mxu0 %v502_v0  ;;  %367 = vmatprep.subr.bf16.mxu1 %v502_v0  ;;  %s469_s8 = scalar_lea.vmem %s297_s7, 256  ;;  %p474_p2 = scmp.lt.s32.totalorder %s297_s7, %s297_s7 }
  0x31   :  { %p470_p1 = scmp.ne.s32.totalorder %s297_s7, %s469_s8  ;;  %p475_p3 = scmp.lt.s32.totalorder %s469_s8, %s469_s8 }
  0x33   :  { %348 = vmatpush3.bf16.msra.mxu0 %v395_v3  ;;  %368 = vmatpush3.bf16.msra.mxu1 %v403_v8  ;;  %p476_p4 = por %p475_p3, %p474_p2 }
  0x34   :  { %349 = vmatprep.subr.bf16.mxu0 %v502_v0  ;;  %369 = vmatprep.subr.bf16.mxu1 %v502_v0 }
  0x35   :  { %p477_p5 = pnand %p476_p4, %p470_p1 }
  0x37   :  { %350 = vmatpush3.bf16.msra.mxu0 %v396_v5  ;;  %370 = vmatpush3.bf16.msra.mxu1 %v404_v10 }
  0x38   :  { %351 = vmatprep.subr.bf16.mxu0 %v502_v0  ;;  %371 = vmatprep.subr.bf16.mxu1 %v502_v0 }
  0x3b   :  { %352 = vmatpush3.bf16.msra.mxu0 %v397_v7  ;;  %372 = vmatpush3.bf16.msra.mxu1 %v405_v12 }
  0x3c   :  { %353 = vmatprep.subr.bf16.mxu0 %v502_v0  ;;  %373 = vmatprep.subr.bf16.mxu1 %v502_v0 }
  0x3f   :  { %354 = vmatpush3.bf16.msra.mxu0 %v398_v9  ;;  %374 = vmatpush3.bf16.msra.mxu1 %v406_v17 }
  0x40   :  { %355 = vmatprep.subr.bf16.mxu0 %v502_v0  ;;  %375 = vmatprep.subr.bf16.mxu1 %v502_v0 }
  0x43   :  { %356 = vmatpush3.bf16.msra.mxu0 %v399_v11  ;;  %376 = vmatpush3.bf16.msra.mxu1 %v407_v18 }
  0x44   :  { %357 = vmatprep.subr.bf16.mxu0 %v502_v0  ;;  %377 = vmatprep.subr.bf16.mxu1 %v502_v0 }
  0x47   :  { %358 = vmatpush3.bf16.msra.mxu0 %v400_v13  ;;  %378 = vmatpush3.bf16.msra.mxu1 %v408_v19 }
  0x4a   :  { %360 = vmatmul.mubr.bf16.vlgmr.msra.gmra.mxu0 %v63_v16 }
 0x10a   :  { %v166_v25 = vpop.f32.mrf.mxu0 }
 0x10b   :  { %v167_v27 = vadd.f32 %v166_v25, %v83_v24 }
 0x10c   :  { %v361_v26 = vpop.f32.mrf.mxu0 }
 0x10d   :  { %v173_v31 = vmax.f32 %v167_v27, 0.0 }
 0x10e   :  { %v169_v28 = vpop.f32.mrf.mxu0 }
 0x10f   :  { %v170_v29 = vadd.f32 %v169_v28, %v83_v24 }
 0x110   :  { %v362_v30 = vpop.f32.mrf.mxu0 }
 0x111   :  { %v174_v32 = vmax.f32 %v170_v29, 0.0 }
 0x113   :  { %v175_v33 = vpack.c.bf16 %v174_v32, %v173_v31 }
 0x115   :  { %380 = vmatmul.mubr.bf16.vlgmr.msra.gmra.mxu1 %v175_v33 }
 0x1d5   :  { %v278_v36 = vpop.f32.mrf.mxu1 }
 0x1d6   :  { %v279_v37 = vadd.f32 %v278_v36, %v195_v35 }
 0x1d7   :  { %v381_v38 = vpop.f32.mrf.mxu1 }
 0x1d8   :  { %v285_v39 = vmax.f32 %v279_v37, 0.0 }
 0x1d9   :  { %v281_v40 = vpop.f32.mrf.mxu1 }
 0x1da   :  { %v287_v41 = vadd.f32 %v285_v39, %v61_v14  ;;  %v282_v42 = vadd.f32 %v281_v40, %v195_v35 }
 0x1db   :  { %v382_v43 = vpop.f32.mrf.mxu1 }
 0x1dc   :  { %289 = vst [vmem:[#allocation8] sm:$0xff] %v287_v41  ;;  %v286_v44 = vmax.f32 %v282_v42, 0.0 }
 0x1de   :  { %v288_v45 = vadd.f32 %v286_v44, %v62_v15 }
 0x1e0   :  { %290 = vst [vmem:[#allocation8 + $0x8] sm:$0xff] %v288_v45 }
 0x1e1   :  { %480 = shalt.err (!%p477_p5)
}
 0x1e2   :  { %302 = dma.vmem_to_hbm [thread:$0]  %s297_s7, 256, %s555_s4, [#allocation4], %s499_s25, %s499_s25, %s500_s26  }
 0x1e3   :  { %493 = dma.done.wait [#allocation4], 256  }
 0x1e4   :  { %494 = vsyncadd [#allocation4], 4294967040 }
 0x1e5   :  { %306 = vsyncpa [#allocation3], 1 }
 0x1e6   :  { %307 = vsyncpa [#allocation6], 1 }
 0x1e7   :  { %308 = vsyncpa [#allocation4], 1 }

// kernel: tpu_custom_call.1
= control target key start
LH: loop header
LB: loop body
LE: loop exit
PB: predicated region body
PF: predicated region fallthrough
CT: control target
= control target key end

     0   :  { %9 = vsyncpa [#allocation3], 0  ;;  %s551_s0 = inlined_call_operand.hbm [shape: f32[16,128], index: 0, kind: input, shape index: {}]   ;;  %s552_s1 = inlined_call_operand.hbm [shape: bf16[128,128], index: 1, kind: input, shape index: {}]   ;;  %s553_s2 = inlined_call_operand.hbm [shape: bf16[128,128], index: 2, kind: input, shape index: {}]   ;;  %s554_s3 = inlined_call_operand.vmem [shape: f32[2,128], index: 3, kind: input, shape index: {}]   ;;  %s555_s4 = inlined_call_operand.hbm [shape: f32[16,128], index: 4, kind: output, shape index: {}]  }
   0x1   :  { %10 = vsyncpa [#allocation6], 0 }
   0x2   :  { %11 = vsyncpa [#allocation4], 0  ;;  %s495_s15 = smov [#allocation5]  }
   0x3   :  { %s29_s16 = sshll.u32 %s495_s15, 4  ;;  %s30_s16 = int_to_ptr.vmem [resolvable:$true] %s29_s16 }
   0x4   :  { %s417_s17 = scalar_lea.vmem %s30_s16, 1024  ;;  %p422_p1 = scmp.lt.s32.totalorder %s30_s16, %s30_s16 }
   0x5   :  { %p418_p0 = scmp.ne.s32.totalorder %s30_s16, %s417_s17  ;;  %p423_p2 = scmp.lt.s32.totalorder %s417_s17, %s417_s17 }
   0x7   :  { %p424_p3 = por %p423_p2, %p422_p1 }
   0x9   :  { %p425_p4 = pnand %p424_p3, %p418_p0 }
   0xb   :  { %428 = shalt.err (!%p425_p4)
}
   0xc   :  { %s496_s18 = smov 64   ;;  %s497_s19 = smov 4  }
   0xd   :  { %35 = dma.hbm_to_vmem [thread:$0]  %s552_s1, 1024, %s30_s16, [#allocation6], %s496_s18, %s496_s18, %s497_s19  }
   0xe   :  { %s498_s22 = smov [#allocation2]  }
   0xf   :  { %s17_s23 = sshll.u32 %s498_s22, 4  ;;  %s18_s23 = int_to_ptr.vmem [resolvable:$true] %s17_s23 }
  0x10   :  { %s437_s24 = scalar_lea.vmem %s18_s23, 256  ;;  %p442_p6 = scmp.lt.s32.totalorder %s18_s23, %s18_s23 }
  0x11   :  { %p438_p5 = scmp.ne.s32.totalorder %s18_s23, %s437_s24  ;;  %p443_p7 = scmp.lt.s32.totalorder %s437_s24, %s437_s24 }
  0x13   :  { %p444_p8 = por %p443_p7, %p442_p6 }
  0x15   :  { %p445_p9 = pnand %p444_p8, %p438_p5 }
  0x17   :  { %448 = shalt.err (!%p445_p9)
}
  0x18   :  { %s499_s25 = smov 128   ;;  %s500_s26 = smov 8  }
  0x19   :  { %23 = dma.hbm_to_vmem [thread:$0]  %s551_s0, 256, %s18_s23, [#allocation3], %s499_s25, %s499_s25, %s500_s26  }
  0x1a   :  { %s501_s1 = smov [#allocation7]  }
  0x1b   :  { %s41_s29 = sshll.u32 %s501_s1, 4  ;;  %s42_s29 = int_to_ptr.vmem [resolvable:$true] %s41_s29 }
  0x1c   :  { %s457_s30 = scalar_lea.vmem %s42_s29, 1024  ;;  %p462_p11 = scmp.lt.s32.totalorder %s42_s29, %s42_s29 }
  0x1d   :  { %p458_p10 = scmp.ne.s32.totalorder %s42_s29, %s457_s30  ;;  %p463_p12 = scmp.lt.s32.totalorder %s457_s30, %s457_s30 }
  0x1f   :  { %p464_p13 = por %p463_p12, %p462_p11 }
  0x21   :  { %p465_p0 = pnand %p464_p13, %p458_p10 }
  0x23   :  { %468 = shalt.err (!%p465_p0)
}
  0x24   :  { %47 = dma.hbm_to_vmem [thread:$0]  %s553_s2, 1024, %s42_s29, [#allocation6], %s496_s18, %s496_s18, %s497_s19  }
  0x25   :  { %489 = dma.done.wait [#allocation3], 256  }
  0x26   :  { %490 = vsyncadd [#allocation3], 4294967040 }
  0x27   :  { %491 = dma.done.wait [#allocation6], 2048  }
  0x28   :  { %492 = vsyncadd [#allocation6], 4294965248  ;;  %v502_v0 = vmov 0.0   ;;  %vm503_vm0 = vmmov 0   ;;  %v393_v1 = vld [vmem:[#allocation5 + $0x38] sm:$0xff]   ;;  %v394_v2 = vld [vmem:[#allocation5 + $0x30] sm:$0xff]   ;;  %v80_v20 = vlaneseq }
  0x29   :  { %343 = vmatprep.subr.bf16.mxu0 %v502_v0  ;;  %359 = vmatprep.mubr.msk.bf16.mxu0 %vm503_vm0, %v502_v0  ;;  %v395_v3 = vld [vmem:[#allocation5 + $0x28] sm:$0xff]   ;;  %v401_v4 = vld [vmem:[#allocation7 + $0x38] sm:$0xff]   ;;  %v396_v5 = vld [vmem:[#allocation5 + $0x20] sm:$0xff]  }
  0x2a   :  { %363 = vmatprep.subr.bf16.mxu1 %v502_v0  ;;  %379 = vmatprep.mubr.msk.bf16.mxu1 %vm503_vm0, %v502_v0  ;;  %v402_v6 = vld [vmem:[#allocation7 + $0x30] sm:$0xff]   ;;  %v397_v7 = vld [vmem:[#allocation5 + $0x18] sm:$0xff]   ;;  %v403_v8 = vld [vmem:[#allocation7 + $0x28] sm:$0xff]   ;;  %v81_v21 = vshrl.u32 %v80_v20, 7 }
  0x2b   :  { %344 = vmatpush3.bf16.msra.mxu0 %v393_v1  ;;  %364 = vmatpush3.bf16.msra.mxu1 %v401_v4  ;;  %v398_v9 = vld [vmem:[#allocation5 + $0x10] sm:$0xff]   ;;  %v404_v10 = vld [vmem:[#allocation7 + $0x20] sm:$0xff]   ;;  %v399_v11 = vld [vmem:[#allocation5 + $0x8] sm:$0xff]  }
  0x2c   :  { %345 = vmatprep.subr.bf16.mxu0 %v502_v0  ;;  %365 = vmatprep.subr.bf16.mxu1 %v502_v0  ;;  %v405_v12 = vld [vmem:[#allocation7 + $0x18] sm:$0xff]   ;;  %v400_v13 = vld [vmem:[#allocation5] sm:$0xff]   ;;  %v61_v14 = vld [vmem:[#allocation2] sm:$0xff]  ;;  %v82_v22 = vsub.s32 0, %v81_v21  ;;  %v194_v34 = vsub.s32 1, %v81_v21 }
  0x2d   :  { %v62_v15 = vld [vmem:[#allocation2 + $0x8] sm:$0xff]  ;;  %v406_v17 = vld [vmem:[#allocation7 + $0x10] sm:$0xff]   ;;  %v407_v18 = vld [vmem:[#allocation7 + $0x8] sm:$0xff]  }
  0x2e   :  { %v63_v16 = vpack.c.bf16 %v62_v15, %v61_v14  ;;  %v408_v19 = vld [vmem:[#allocation7] sm:$0xff]   ;;  %v60_v23 = vld [vmem:[%s554_s3] sm:$0x3]  ;;  %s504_s3 = smov [#allocation8]  }
  0x2f   :  { %346 = vmatpush3.bf16.msra.mxu0 %v394_v2  ;;  %366 = vmatpush3.bf16.msra.mxu1 %v402_v6  ;;  %v83_v24 = vrot.slane %v60_v23, %v82_v22  ;;  %v195_v35 = vrot.slane %v60_v23, %v194_v34  ;;  %s296_s7 = sshll.u32 %s504_s3, 4  ;;  %s297_s7 = int_to_ptr.vmem [resolvable:$true] %s296_s7 }
  0x30   :  { %347 = vmatprep.subr.bf16.mxu0 %v502_v0  ;;  %367 = vmatprep.subr.bf16.mxu1 %v502_v0  ;;  %s469_s8 = scalar_lea.vmem %s297_s7, 256  ;;  %p474_p2 = scmp.lt.s32.totalorder %s297_s7, %s297_s7 }
  0x31   :  { %p470_p1 = scmp.ne.s32.totalorder %s297_s7, %s469_s8  ;;  %p475_p3 = scmp.lt.s32.totalorder %s469_s8, %s469_s8 }
  0x33   :  { %348 = vmatpush3.bf16.msra.mxu0 %v395_v3  ;;  %368 = vmatpush3.bf16.msra.mxu1 %v403_v8  ;;  %p476_p4 = por %p475_p3, %p474_p2 }
  0x34   :  { %349 = vmatprep.subr.bf16.mxu0 %v502_v0  ;;  %369 = vmatprep.subr.bf16.mxu1 %v502_v0 }
  0x35   :  { %p477_p5 = pnand %p476_p4, %p470_p1 }
  0x37   :  { %350 = vmatpush3.bf16.msra.mxu0 %v396_v5  ;;  %370 = vmatpush3.bf16.msra.mxu1 %v404_v10 }
  0x38   :  { %351 = vmatprep.subr.bf16.mxu0 %v502_v0  ;;  %371 = vmatprep.subr.bf16.mxu1 %v502_v0 }
  0x3b   :  { %352 = vmatpush3.bf16.msra.mxu0 %v397_v7  ;;  %372 = vmatpush3.bf16.msra.mxu1 %v405_v12 }
  0x3c   :  { %353 = vmatprep.subr.bf16.mxu0 %v502_v0  ;;  %373 = vmatprep.subr.bf16.mxu1 %v502_v0 }
  0x3f   :  { %354 = vmatpush3.bf16.msra.mxu0 %v398_v9  ;;  %374 = vmatpush3.bf16.msra.mxu1 %v406_v17 }
  0x40   :  { %355 = vmatprep.subr.bf16.mxu0 %v502_v0  ;;  %375 = vmatprep.subr.bf16.mxu1 %v502_v0 }
  0x43   :  { %356 = vmatpush3.bf16.msra.mxu0 %v399_v11  ;;  %376 = vmatpush3.bf16.msra.mxu1 %v407_v18 }
  0x44   :  { %357 = vmatprep.subr.bf16.mxu0 %v502_v0  ;;  %377 = vmatprep.subr.bf16.mxu1 %v502_v0 }
  0x47   :  { %358 = vmatpush3.bf16.msra.mxu0 %v400_v13  ;;  %378 = vmatpush3.bf16.msra.mxu1 %v408_v19 }
  0x4a   :  { %360 = vmatmul.mubr.bf16.vlgmr.msra.gmra.mxu0 %v63_v16 }
 0x10a   :  { %v166_v25 = vpop.f32.mrf.mxu0 }
 0x10b   :  { %v167_v27 = vadd.f32 %v166_v25, %v83_v24 }
 0x10c   :  { %v361_v26 = vpop.f32.mrf.mxu0 }
 0x10d   :  { %v173_v31 = vmax.f32 %v167_v27, 0.0 }
 0x10e   :  { %v169_v28 = vpop.f32.mrf.mxu0 }
 0x10f   :  { %v170_v29 = vadd.f32 %v169_v28, %v83_v24 }
 0x110   :  { %v362_v30 = vpop.f32.mrf.mxu0 }
 0x111   :  { %v174_v32 = vmax.f32 %v170_v29, 0.0 }
 0x113   :  { %v175_v33 = vpack.c.bf16 %v174_v32, %v173_v31 }
 0x115   :  { %380 = vmatmul.mubr.bf16.vlgmr.msra.gmra.mxu1 %v175_v33 }
 0x1d5   :  { %v278_v36 = vpop.f32.mrf.mxu1 }
 0x1d6   :  { %v279_v37 = vadd.f32 %v278_v36, %v195_v35 }
 0x1d7   :  { %v381_v38 = vpop.f32.mrf.mxu1 }
 0x1d8   :  { %v285_v39 = vmax.f32 %v279_v37, 0.0 }
 0x1d9   :  { %v281_v40 = vpop.f32.mrf.mxu1 }
 0x1da   :  { %v287_v41 = vadd.f32 %v285_v39, %v61_v14  ;;  %v282_v42 = vadd.f32 %v281_v40, %v195_v35 }
 0x1db   :  { %v382_v43 = vpop.f32.mrf.mxu1 }
 0x1dc   :  { %289 = vst [vmem:[#allocation8] sm:$0xff] %v287_v41  ;;  %v286_v44 = vmax.f32 %v282_v42, 0.0 }
 0x1de   :  { %v288_v45 = vadd.f32 %v286_v44, %v62_v15 }
 0x1e0   :  { %290 = vst [vmem:[#allocation8 + $0x8] sm:$0xff] %v288_v45 }
 0x1e1   :  { %480 = shalt.err (!%p477_p5)
}
 0x1e2   :  { %302 = dma.vmem_to_hbm [thread:$0]  %s297_s7, 256, %s555_s4, [#allocation4], %s499_s25, %s499_s25, %s500_s26  }
 0x1e3   :  { %493 = dma.done.wait [#allocation4], 256  }
 0x1e4   :  { %494 = vsyncadd [#allocation4], 4294967040 }
 0x1e5   :  { %306 = vsyncpa [#allocation3], 1 }
 0x1e6   :  { %307 = vsyncpa [#allocation6], 1 }
 0x1e7   :  { %308 = vsyncpa [#allocation4], 1 }

</bundles_post_ra>
